<compile_context>
chip_gen: v6e
topology: v6e:2x2x1
jax: 0.10.0
libtpu: 0.0.40
codegen_flags: <defaults>
</compile_context>

<pallas_src>
import functools

import numpy as np

import jax
import jax.numpy as jnp
from jax.experimental import pallas as pl
from jax.experimental.pallas import tpu as pltpu


def _round_up(n: int, m: int) -> int:
    return -(-n // m) * m


def _is_v7x() -> bool:
    try:
        return "v7" in jax.devices()[0].device_kind.lower()
    except Exception:  # pragma: no cover - conservative fallback
        return False


def _build_avg_matrix_np(seq_len: int, lp: int, kernel_size: int) -> np.ndarray:
    """Host-side (Lp, Lp) matrix A with A[i, t] = weight of x[i] in mean[t].

    mean[t] = (1/k) * sum_{j=-pad..pad} x[clip(t + j, 0, L-1)]
    (edge-replication padding, stride 1).  Clipping makes this valid for any
    odd kernel_size, including kernel_size > 2L - 1.  Rows/cols >= L are zero
    so the padded time lanes contribute nothing and produce zeros.
    """
    pad = (kernel_size - 1) // 2
    a = np.zeros((lp, lp), dtype=np.float32)
    t = np.arange(seq_len)
    w = np.float32(1.0 / kernel_size)
    for j in range(kernel_size):
        src = np.clip(t + (j - pad), 0, seq_len - 1)
        a[src, t] += w   # (src[t], t) pairs are unique within one j -> safe
    return a


def _pick_row_block(rows_p8: int, lp: int, itemsize: int, is_v7: bool) -> int:
    """Rows of the (rows_p8, Lp) slab per grid step.

    ~2 MiB input block (tiling-curve plateau), multiple of 8 (sublane), and
    capped so double-buffered (1 input + 2 output) blocks plus a
    double-buffered f32 A matrix stay under the per-generation VMEM budget.
    """
    target_in_block_bytes = 2 << 20
    tr = max(8, (target_in_block_bytes // max(itemsize * lp, 1)) // 8 * 8)

    budget = (36 << 20) if is_v7 else (52 << 20)
    a_bytes = 2 * lp * lp * 4                       # A, double-buffered, f32 worst case
    per_row_live = 2 * lp * (3 * itemsize)          # 2 buffers x (1 in + 2 out) rows
    tr_cap = max(8, ((budget - a_bytes) // max(per_row_live, 1)) // 8 * 8)

    tr = min(tr, tr_cap, 2048, rows_p8)
    return max(tr, 8)


def _series_decomp_kernel(x_ref, a_ref, res_ref, mean_ref):
    """One (TR, Lp) block: rows = batch*channel (sublanes), time = lanes.

    mean = x @ A (banded averaging matrix on the MXU), res = x - mean.
    The matmul accumulates in f32 regardless of input dtype.
    """
    x = x_ref[...]
    mean = jnp.dot(x, a_ref[...], preferred_element_type=jnp.float32)
    res = x.astype(jnp.float32) - mean
    mean_ref[...] = mean.astype(mean_ref.dtype)
    res_ref[...] = res.astype(res_ref.dtype)


@functools.partial(jax.jit, static_argnames=("kernel_size",))
def series_decomp(x: jax.Array, kernel_size: int):
    """SeriesDecomp forward: x is (B, L, C); returns (res, moving_mean)."""
    if kernel_size < 1 or kernel_size % 2 == 0:
        # Even kernel_size changes the output length in the PyTorch module
        # (AvgPool1d gives L-1); only the odd, length-preserving case is supported.
        raise ValueError("series_decomp requires an odd kernel_size >= 1")

    B, L, C = x.shape
    rows = B * C
    rows_p8 = _round_up(rows, 8)
    Lp = _round_up(L, 128)
    itemsize = jnp.dtype(x.dtype).itemsize

    is_v7 = _is_v7x()
    vmem_limit = (44 << 20) if is_v7 else (64 << 20)

    tr = _pick_row_block(rows_p8, Lp, itemsize, is_v7)
    steps = pl.cdiv(rows_p8, tr)

    # v7x only (2 TensorCores): avoid a small odd number of parallel steps.
    if is_v7 and 1 < steps <= 6 and steps % 2 == 1:
        tr_even = max(8, _round_up(pl.cdiv(rows_p8, steps + 1), 8))
        if pl.cdiv(rows_p8, tr_even) % 2 == 0:
            tr = tr_even
            steps = pl.cdiv(rows_p8, tr)

    # Lane-dense layout: time on the 128-lane axis, padded to a multiple of
    # 128; rows padded only to a multiple of 8.  The transpose, reshape and
    # pad fuse into one XLA relayout.
    xt = jnp.transpose(x, (0, 2, 1)).reshape(rows, L)
    if rows_p8 != rows or Lp != L:
        xt = jnp.pad(xt, ((0, rows_p8 - rows), (0, Lp - L)))

    # Averaging matrix: compile-time host constant; bf16 when x is bf16 so the
    # MXU runs its native bf16 path, f32 otherwise (exact PyTorch numerics).
    a_dtype = jnp.bfloat16 if x.dtype == jnp.bfloat16 else jnp.float32
    avg_mat = jnp.asarray(_build_avg_matrix_np(L, Lp, kernel_size), dtype=a_dtype)

    row_spec = pl.BlockSpec((tr, Lp), lambda i: (i, 0))
    mat_spec = pl.BlockSpec((Lp, Lp), lambda i: (0, 0))   # constant block: no re-DMA

    res_t, mean_t = pl.pallas_call(
        _series_decomp_kernel,
        out_shape=(
            jax.ShapeDtypeStruct((rows_p8, Lp), x.dtype),   # res
            jax.ShapeDtypeStruct((rows_p8, Lp), x.dtype),   # moving_mean
        ),
        grid=(steps,),
        in_specs=[row_spec, mat_spec],
        out_specs=(row_spec, row_spec),
        compiler_params=pltpu.CompilerParams(
            dimension_semantics=("parallel",),
            vmem_limit_bytes=vmem_limit,
        ),
        cost_estimate=pl.CostEstimate(
            flops=2 * rows * L * L,
            transcendentals=0,
            bytes_accessed=3 * rows * L * itemsize,
        ),
    )(xt, avg_mat)

    def _back(y):
        return jnp.transpose(y[:rows, :L].reshape(B, C, L), (0, 2, 1))

    return _back(res_t), _back(mean_t)


def _series_decomp_ref(x: jax.Array, kernel_size: int):
    """Pure-JAX reference mirroring the PyTorch module exactly."""
    pad = (kernel_size - 1) // 2
    front = jnp.repeat(x[:, 0:1, :], pad, axis=1)
    end = jnp.repeat(x[:, -1:, :], pad, axis=1)
    xp = jnp.concatenate([front, x, end], axis=1)          # (B, L+k-1, C)
    L = x.shape[1]
    windows = jnp.stack([xp[:, t: t + kernel_size, :] for t in range(L)], axis=1)
    mean = windows.mean(axis=2)
    return x - mean, mean


if __name__ == "__main__":
    key = jax.random.PRNGKey(0)
    configs = [
        # (B, L, C, kernel_size) — tiny sanity case + DLinear-style case.
        (2, 16, 4, 5),
        (4, 96, 7, 25),
    ]
    for i, (B, L, C, k) in enumerate(configs):
        key, sub = jax.random.split(key)
        x = jax.random.normal(sub, (B, L, C), dtype=jnp.float32)

        res, mean = series_decomp(x, kernel_size=k)
        jax.block_until_ready((res, mean))

        res_ref, mean_ref = _series_decomp_ref(x, k)
        assert res.shape == x.shape and mean.shape == x.shape
        assert jnp.allclose(mean, mean_ref, atol=1e-5), f"moving_mean mismatch (cfg {i})"
        assert jnp.allclose(res, res_ref, atol=1e-5), f"res mismatch (cfg {i})"
        assert jnp.allclose(res + mean, x, atol=1e-5), f"decomposition not exact (cfg {i})"

    print("KERNEL_OK")
</pallas_src>

<mosaic_0001>
module attributes {stable_mosaic.version = 11 : i64} {
  func.func @_series_decomp_kernel(%arg0: i32, %arg1: memref<8x128xf32, #tpu.memory_space<vmem>>, %arg2: memref<128x128xf32, #tpu.memory_space<vmem>>, %arg3: memref<8x128xf32, #tpu.memory_space<vmem>>, %arg4: memref<8x128xf32, #tpu.memory_space<vmem>>) attributes {dimension_semantics = [#tpu.dimension_semantics<parallel>], iteration_bounds = array<i64: 1>, scalar_prefetch = 0 : i64, scratch_operands = 0 : i64, tpu.core_type = #tpu.core_type<tc>, window_params = [{transform_indices = @transform_0, window_bounds = array<i64: 8, 128>}, {pipeline_mode = #tpu.pipeline_mode<synchronous>, transform_indices = @transform_1, window_bounds = array<i64: 128, 128>}, {transform_indices = @transform_2, window_bounds = array<i64: 8, 128>}, {transform_indices = @transform_3, window_bounds = array<i64: 8, 128>}]} {
    %c0 = arith.constant 0 : index
    %c0_0 = arith.constant 0 : index
    %0 = vector.load %arg1[%c0, %c0_0] : memref<8x128xf32, #tpu.memory_space<vmem>>, vector<8x128xf32>
    %c0_1 = arith.constant 0 : index
    %c0_2 = arith.constant 0 : index
    %1 = vector.load %arg2[%c0_1, %c0_2] : memref<128x128xf32, #tpu.memory_space<vmem>>, vector<128x128xf32>
    %cst = arith.constant dense<0.000000e+00> : vector<8x128xf32>
    %2 = tpu.matmul %0, %1, %cst {dimension_numbers = #tpu.dot_dimension_numbers<[1], [0], [0], [1], [0, 0, 1, 1], [], []>} : vector<8x128xf32>, vector<128x128xf32>, vector<8x128xf32> -> vector<8x128xf32>
    %3 = arith.subf %0, %2 : vector<8x128xf32>
    %c0_3 = arith.constant 0 : index
    %c0_4 = arith.constant 0 : index
    %4 = vector.load %arg4[%c0_3, %c0_4] : memref<8x128xf32, #tpu.memory_space<vmem>>, vector<8x128xf32>
    tpu.vector_store %arg4[%c0_3, %c0_4], %2 {strides = array<i32>} : memref<8x128xf32, #tpu.memory_space<vmem>>, vector<8x128xf32>,
    %c0_5 = arith.constant 0 : index
    %c0_6 = arith.constant 0 : index
    %5 = vector.load %arg3[%c0_5, %c0_6] : memref<8x128xf32, #tpu.memory_space<vmem>>, vector<8x128xf32>
    tpu.vector_store %arg3[%c0_5, %c0_6], %3 {strides = array<i32>} : memref<8x128xf32, #tpu.memory_space<vmem>>, vector<8x128xf32>,
    return
  }
  func.func @transform_0(%arg0: i32) -> (i32, i32) {
    %c0_i32 = arith.constant 0 : i32
    %c0_i32_0 = arith.constant 0 : i32
    return %arg0, %c0_i32 : i32, i32
  }
  func.func @transform_1(%arg0: i32) -> (i32, i32) {
    %c0_i32 = arith.constant 0 : i32
    %c0_i32_0 = arith.constant 0 : i32
    %c0_i32_1 = arith.constant 0 : i32
    return %c0_i32, %c0_i32_0 : i32, i32
  }
  func.func @transform_2(%arg0: i32) -> (i32, i32) {
    %c0_i32 = arith.constant 0 : i32
    %c0_i32_0 = arith.constant 0 : i32
    return %arg0, %c0_i32 : i32, i32
  }
  func.func @transform_3(%arg0: i32) -> (i32, i32) {
    %c0_i32 = arith.constant 0 : i32
    %c0_i32_0 = arith.constant 0 : i32
    return %arg0, %c0_i32 : i32, i32
  }
}

</mosaic_0001>

<bundles_post_ra>
// kernel: series_decomp.1
= control target key start
LH: loop header
LB: loop body
LE: loop exit
PB: predicated region body
PF: predicated region fallthrough
CT: control target
= control target key end

     0   :  { %9 = vsyncpa [#allocation3], 0  ;;  %s312_s0 = inlined_call_operand.vmem [shape: f32[8,128], index: 0, kind: input, shape index: {}]   ;;  %s313_s1 = inlined_call_operand.hbm [shape: f32[128,128], index: 1, kind: input, shape index: {}]   ;;  %s314_s2 = inlined_call_operand.hbm [shape: f32[8,128], index: 2, kind: output, shape index: {0}]   ;;  %s315_s3 = inlined_call_operand.hbm [shape: f32[8,128], index: 3, kind: output, shape index: {1}]  }
   0x1   :  { %10 = vsyncpa [#allocation4], 0 }
   0x2   :  { %11 = vsyncpa [#allocation7], 0  ;;  %s273_s12 = smov [#allocation2]  }
   0x3   :  { %s19_s13 = sshll.u32 %s273_s12, 4  ;;  %s20_s13 = int_to_ptr.vmem [resolvable:$true] %s19_s13 }
   0x4   :  { %s215_s14 = scalar_lea.vmem %s20_s13, 2048  ;;  %p220_p1 = scmp.lt.s32.totalorder %s20_s13, %s20_s13 }
   0x5   :  { %p216_p0 = scmp.ne.s32.totalorder %s20_s13, %s215_s14  ;;  %p221_p2 = scmp.lt.s32.totalorder %s215_s14, %s215_s14 }
   0x7   :  { %p222_p3 = por %p221_p2, %p220_p1 }
   0x9   :  { %p223_p4 = pnand %p222_p3, %p216_p0 }
   0xb   :  { %226 = shalt.err (!%p223_p4)
}
   0xc   :  { %s274_s15 = smov 128   ;;  %s275_s16 = smov 8  }
   0xd   :  { %25 = dma.hbm_to_vmem [thread:$0]  %s313_s1, 2048, %s20_s13, [#allocation3], %s274_s15, %s274_s15, %s275_s16  }
   0xe   :  { %267 = dma.done.wait [#allocation3], 2048  }
   0xf   :  { %268 = vsyncadd [#allocation3], 4294965248  ;;  %v276_v0 = vmov 0.0   ;;  %vm277_vm0 = vmmov 0   ;;  %v45_v1 = vld [vmem:[#allocation2 + $0x78] sm:$0xff]  ;;  %v44_v2 = vld [vmem:[#allocation2 + $0x70] sm:$0xff] }
  0x10   :  { %165 = vmatprep.subr.mxu0 %v276_v0  ;;  %197 = vmatprep.mubr.msk.f32.mxu0 %vm277_vm0, %v276_v0  ;;  %v43_v3 = vld [vmem:[#allocation2 + $0x68] sm:$0xff]  ;;  %v42_v4 = vld [vmem:[#allocation2 + $0x60] sm:$0xff]  ;;  %v41_v5 = vld [vmem:[#allocation2 + $0x58] sm:$0xff]  ;;  %s278_s20 = smov [#allocation6]   ;;  %s279_s22 = smov [#allocation5]  }
  0x11   :  { %166 = vmatpush3.msra.mxu0 %v45_v1  ;;  %v40_v6 = vld [vmem:[#allocation2 + $0x50] sm:$0xff]  ;;  %v39_v7 = vld [vmem:[#allocation2 + $0x48] sm:$0xff]  ;;  %v38_v8 = vld [vmem:[#allocation2 + $0x40] sm:$0xff]  ;;  %s135_s21 = sshll.u32 %s278_s20, 4  ;;  %s125_s23 = sshll.u32 %s279_s22, 4  ;;  %s136_s21 = int_to_ptr.vmem [resolvable:$true] %s135_s21  ;;  %s126_s23 = int_to_ptr.vmem [resolvable:$true] %s125_s23 }
  0x12   :  { %167 = vmatprep.subr.mxu0 %v276_v0  ;;  %v37_v9 = vld [vmem:[#allocation2 + $0x38] sm:$0xff]  ;;  %v36_v10 = vld [vmem:[#allocation2 + $0x30] sm:$0xff]  ;;  %v35_v11 = vld [vmem:[#allocation2 + $0x28] sm:$0xff]  ;;  %s227_s24 = scalar_lea.vmem %s136_s21, 128  ;;  %p232_p6 = scmp.lt.s32.totalorder %s136_s21, %s136_s21 }
  0x13   :  { %168 = vmatpush3.msra.mxu0 %v44_v2  ;;  %v34_v12 = vld [vmem:[#allocation2 + $0x20] sm:$0xff]  ;;  %v33_v13 = vld [vmem:[#allocation2 + $0x18] sm:$0xff]  ;;  %v32_v14 = vld [vmem:[#allocation2 + $0x10] sm:$0xff]  ;;  %p228_p5 = scmp.ne.s32.totalorder %s136_s21, %s227_s24  ;;  %p233_p7 = scmp.lt.s32.totalorder %s227_s24, %s227_s24 }
  0x14   :  { %169 = vmatprep.subr.mxu0 %v276_v0  ;;  %v31_v15 = vld [vmem:[#allocation2 + $0x8] sm:$0xff]  ;;  %v30_v16 = vld [vmem:[#allocation2] sm:$0xff] }
  0x15   :  { %170 = vmatpush3.msra.mxu0 %v43_v3  ;;  %v29_v17 = vld [vmem:[%s312_s0] sm:$0xff]  ;;  %p234_p8 = por %p233_p7, %p232_p6 }
  0x16   :  { %171 = vmatprep.subr.mxu0 %v276_v0 }
  0x17   :  { %172 = vmatpush3.msra.mxu0 %v42_v4  ;;  %p235_p9 = pnand %p234_p8, %p228_p5 }
  0x18   :  { %173 = vmatprep.subr.mxu0 %v276_v0 }
  0x19   :  { %174 = vmatpush3.msra.mxu0 %v41_v5 }
  0x1a   :  { %175 = vmatprep.subr.mxu0 %v276_v0 }
  0x1b   :  { %176 = vmatpush3.msra.mxu0 %v40_v6 }
  0x1c   :  { %177 = vmatprep.subr.mxu0 %v276_v0 }
  0x1d   :  { %178 = vmatpush3.msra.mxu0 %v39_v7 }
  0x1e   :  { %179 = vmatprep.subr.mxu0 %v276_v0 }
  0x1f   :  { %180 = vmatpush3.msra.mxu0 %v38_v8 }
  0x20   :  { %181 = vmatprep.subr.mxu0 %v276_v0 }
  0x21   :  { %182 = vmatpush3.msra.mxu0 %v37_v9 }
  0x22   :  { %183 = vmatprep.subr.mxu0 %v276_v0 }
  0x23   :  { %184 = vmatpush3.msra.mxu0 %v36_v10 }
  0x24   :  { %185 = vmatprep.subr.mxu0 %v276_v0 }
  0x25   :  { %186 = vmatpush3.msra.mxu0 %v35_v11 }
  0x26   :  { %187 = vmatprep.subr.mxu0 %v276_v0 }
  0x27   :  { %188 = vmatpush3.msra.mxu0 %v34_v12 }
  0x28   :  { %189 = vmatprep.subr.mxu0 %v276_v0 }
  0x29   :  { %190 = vmatpush3.msra.mxu0 %v33_v13 }
  0x2a   :  { %191 = vmatprep.subr.mxu0 %v276_v0 }
  0x2b   :  { %192 = vmatpush3.msra.mxu0 %v32_v14 }
  0x2c   :  { %193 = vmatprep.subr.mxu0 %v276_v0 }
  0x2d   :  { %194 = vmatpush3.msra.mxu0 %v31_v15 }
  0x2e   :  { %195 = vmatprep.subr.mxu0 %v276_v0 }
  0x2f   :  { %196 = vmatpush3.msra.mxu0 %v30_v16 }
  0x30   :  { %198 = vmatmul.mubr.f32.vlgmr.msra.gmra.mxu0 %v29_v17 }
  0xf0   :  { %v112_v18 = vpop.f32.mrf.mxu0 }
  0xf1   :  { %v116_v19 = vsub.f32 %v29_v17, %v112_v18  ;;  %117 = vst [vmem:[#allocation6] sm:$0xff] %v112_v18 }
  0xf2   :  { %v199_v20 = vpop.f32.mrf.mxu0 }
  0xf3   :  { %238 = shalt.err (!%p235_p9)
}
  0xf4   :  { %138 = dma.vmem_to_hbm [thread:$0]  %s136_s21, 128, %s315_s3, [#allocation7]   ;;  %118 = vst [vmem:[#allocation5] sm:$0xff] %v116_v19 }
  0xf5   :  { %s247_s26 = scalar_lea.vmem %s126_s23, 128  ;;  %p252_p11 = scmp.lt.s32.totalorder %s126_s23, %s126_s23 }
  0xf6   :  { %p248_p10 = scmp.ne.s32.totalorder %s126_s23, %s247_s26  ;;  %p253_p12 = scmp.lt.s32.totalorder %s247_s26, %s247_s26 }
  0xf8   :  { %p254_p13 = por %p253_p12, %p252_p11 }
  0xfa   :  { %p255_p0 = pnand %p254_p13, %p248_p10 }
  0xfc   :  { %258 = shalt.err (!%p255_p0)
}
  0xfd   :  { %128 = dma.vmem_to_hbm [thread:$0]  %s126_s23, 128, %s314_s2, [#allocation4]  }
  0xfe   :  { %269 = dma.done.wait [#allocation4], 128  }
  0xff   :  { %270 = vsyncadd [#allocation4], 4294967168 }
 0x100   :  { %271 = dma.done.wait [#allocation7], 128  }
 0x101   :  { %272 = vsyncadd [#allocation7], 4294967168 }
 0x102   :  { %145 = vsyncpa [#allocation3], 1 }
 0x103   :  { %146 = vsyncpa [#allocation4], 1 }
 0x104   :  { %147 = vsyncpa [#allocation7], 1 }

</bundles_post_ra>
